<compile_context>
chip_gen: v5e
topology: v5e:2x2
jax: 0.10.0
libtpu: 0.0.40
codegen_flags: <defaults>
</compile_context>

<pallas_src>
import jax
import jax.numpy as jnp
from jax.experimental import pallas as pl
from jax.experimental.pallas import tpu as pltpu

# ----------------------- configuration (mirrors MaskGIN.__init__) -----------------------
NUM_LAYERS = 3        # -> 2 GIN layers
NUM_MLP_LAYERS = 2    # MLP: linear -> BN -> ReLU -> linear
INPUT_DIM = 8
HIDDEN_DIM = 32
OUTPUT_DIM = 8
GIN_EPS = 0.0         # GINConv init_eps = 0 (value of the learnable eps at init)
BN_EPS = 1e-5
MASK_THRESHOLD = 0.5  # 'binarizer' threshold of MaskLinear

LANE = 128            # pad all feature dims to the 128-lane vreg width (zero-padded weights)


# --------------------------------- host-side helpers -------------------------------------
def _pad2(x, rows, cols):
    """Zero-pad a 2-D array up to (rows, cols)."""
    r, c = x.shape
    return jnp.pad(x, ((0, rows - r), (0, cols - c)))


def _fold_bn(w, b, gamma, beta, mean, var):
    """Fold inference-mode BatchNorm into the preceding Linear.

    y = gamma * ((x @ w + b) - mean) * rsqrt(var + eps) + beta
      = x @ (w * s) + ((b - mean) * s + beta),   s = gamma * rsqrt(var + eps)
    """
    scale = gamma * jax.lax.rsqrt(var + BN_EPS)       # [1, out]
    return w * scale, (b - mean) * scale + beta


# --------------------------------- fused Pallas kernel -----------------------------------
def _maskgin_fused_kernel(adj_ref, pool_ref, h_ref,
                          w1a_ref, b1a_ref, w2a_ref, b2a_ref,   # GIN layer 0 (BN folded)
                          w1b_ref, b1b_ref, w2b_ref, b2b_ref,   # GIN layer 1 (BN folded)
                          wp_ref, bp_ref,                       # MaskLinear (mask pre-applied)
                          o_ref):
    adj = adj_ref[...]
    h = h_ref[...]                                    # [N, LANE], stays resident in VMEM

    layers = ((w1a_ref, b1a_ref, w2a_ref, b2a_ref, False),
              (w1b_ref, b1b_ref, w2b_ref, b2b_ref, True))
    for w1_ref, b1_ref, w2_ref, b2_ref, add_residual in layers:
        # GINConv: neighbor SUM aggregation; eps == 0 so (1 + eps) * h == h (mul elided).
        z = h + jnp.dot(adj, h, preferred_element_type=jnp.float32)
        # MLP hidden layer: Linear (BN1 folded in) -> ReLU
        z1 = jnp.dot(z, w1_ref[...], preferred_element_type=jnp.float32) + b1_ref[...]
        z1 = jnp.maximum(z1, 0.0)
        # MLP output Linear (ApplyNodeFunc's BN folded in) -> ReLU
        z2 = jnp.dot(z1, w2_ref[...], preferred_element_type=jnp.float32) + b2_ref[...]
        z2 = jnp.maximum(z2, 0.0)
        h = z2 + h if add_residual else z2            # residual only for layer != 0

    # SumPooling:  [G, N] @ [N, LANE]
    pooled = jnp.dot(pool_ref[...], h, preferred_element_type=jnp.float32)
    # MaskLinear: weight already binarize-masked and padded on the host.
    o_ref[...] = jnp.dot(pooled, wp_ref[...], preferred_element_type=jnp.float32) + bp_ref[...]


# --------------------------------- wrapper ------------------------------------------------
def maskgin_forward(adj, pool_mat, h, params):
    """MaskGIN.forward(g, h): returns score_over_layer of shape [num_graphs, output_dim]."""
    n = adj.shape[0]
    g = pool_mat.shape[0]
    assert len(params["gin"]) == NUM_LAYERS - 1 == 2

    # Pad node features to 128 lanes (padded columns stay exactly zero through the network).
    h_pad = _pad2(h, n, LANE)

    flat = [adj, pool_mat, h_pad]
    for p in params["gin"]:
        w1, b1 = _fold_bn(p["w1"], p["b1"], p["g1"], p["be1"], p["m1"], p["v1"])
        w2, b2 = _fold_bn(p["w2"], p["b2"], p["g3"], p["be3"], p["m3"], p["v3"])
        flat += [_pad2(w1, LANE, LANE), _pad2(b1, 1, LANE),
                 _pad2(w2, LANE, LANE), _pad2(b2, 1, LANE)]

    pr = params["pred"]
    wm = pr["w"] * (pr["mask"] > MASK_THRESHOLD).astype(jnp.float32)   # binarizer + mask apply
    flat += [_pad2(wm, LANE, LANE), _pad2(pr["b"], 1, LANE)]

    # Advisory cost estimate (2 layers: A@H + 2 Linears each; then pooling + prediction).
    flops = (NUM_LAYERS - 1) * (2 * n * n * LANE + 2 * (2 * n * LANE * LANE)) \
            + 2 * g * n * LANE + 2 * g * LANE * LANE
    bytes_accessed = 4 * (sum(int(a.size) for a in flat) + g * LANE)

    out = pl.pallas_call(
        _maskgin_fused_kernel,
        out_shape=jax.ShapeDtypeStruct((g, LANE), jnp.float32),
        cost_estimate=pl.CostEstimate(flops=flops, transcendentals=0,
                                      bytes_accessed=bytes_accessed),
    )(*flat)

    # TODO(synk): self.drop(final_dropout) is identity here (deterministic inference).
    return out[:, :OUTPUT_DIM]


# --------------------------------- pure-JAX reference ------------------------------------
def maskgin_reference(adj, pool_mat, h, params):
    """Unfused, unfolded reference matching the original PyTorch forward (inference mode)."""
    for i, p in enumerate(params["gin"]):
        z = (1.0 + GIN_EPS) * h + adj @ h
        z1 = z @ p["w1"] + p["b1"]
        z1 = p["g1"] * (z1 - p["m1"]) * jax.lax.rsqrt(p["v1"] + BN_EPS) + p["be1"]
        z1 = jnp.maximum(z1, 0.0)
        z2 = z1 @ p["w2"] + p["b2"]
        z3 = p["g3"] * (z2 - p["m3"]) * jax.lax.rsqrt(p["v3"] + BN_EPS) + p["be3"]
        z3 = jnp.maximum(z3, 0.0)
        h = z3 + h if i != 0 else z3
    pooled = pool_mat @ h
    pr = params["pred"]
    wm = pr["w"] * (pr["mask"] > MASK_THRESHOLD).astype(jnp.float32)
    return pooled @ wm + pr["b"]


# --------------------------------- parameter init ----------------------------------------
def init_params(key):
    def dense(k, shape, scale=0.1):
        return scale * jax.random.normal(k, shape, jnp.float32)

    keys = iter(jax.random.split(key, 64))
    gin_params = []
    for layer in range(NUM_LAYERS - 1):
        din = INPUT_DIM if layer == 0 else HIDDEN_DIM
        gin_params.append(dict(
            w1=dense(next(keys), (din, HIDDEN_DIM)),            # Linear stored as [in, out]
            b1=dense(next(keys), (1, HIDDEN_DIM)),
            g1=1.0 + dense(next(keys), (1, HIDDEN_DIM)),        # BN gamma
            be1=dense(next(keys), (1, HIDDEN_DIM)),             # BN beta
            m1=dense(next(keys), (1, HIDDEN_DIM)),              # BN running_mean
            v1=1.0 + 0.1 * jnp.abs(jax.random.normal(next(keys), (1, HIDDEN_DIM))),  # running_var
            w2=dense(next(keys), (HIDDEN_DIM, HIDDEN_DIM)),
            b2=dense(next(keys), (1, HIDDEN_DIM)),
            g3=1.0 + dense(next(keys), (1, HIDDEN_DIM)),
            be3=dense(next(keys), (1, HIDDEN_DIM)),
            m3=dense(next(keys), (1, HIDDEN_DIM)),
            v3=1.0 + 0.1 * jnp.abs(jax.random.normal(next(keys), (1, HIDDEN_DIM))),
        ))
    pred = dict(
        w=dense(next(keys), (HIDDEN_DIM, OUTPUT_DIM)),
        # NOTE: module default mask_init='1s' with mask_scale=0.01 gives an all-zero binarized
        # mask at init; use a uniform real-valued mask so the masked-matmul path is non-trivial.
        mask=jax.random.uniform(next(keys), (HIDDEN_DIM, OUTPUT_DIM), jnp.float32),
        b=dense(next(keys), (1, OUTPUT_DIM)),
    )
    return dict(gin=gin_params, pred=pred)


# --------------------------------------- main --------------------------------------------
if __name__ == "__main__":
    key = jax.random.PRNGKey(0)
    k_adj, k_h, k_p = jax.random.split(key, 3)

    # Batched graph: 2 graphs with 7 and 9 nodes (g.batch_num_nodes = [7, 9]), N = 16 nodes.
    batch_num_nodes = [7, 9]
    n_nodes = sum(batch_num_nodes)
    n_graphs = len(batch_num_nodes)

    seg = jnp.concatenate([jnp.full((n,), i, jnp.int32)
                           for i, n in enumerate(batch_num_nodes)])
    pool_mat = (seg[None, :] == jnp.arange(n_graphs)[:, None]).astype(jnp.float32)  # [G, N]

    # Random undirected adjacency, no self loops, block-diagonal per graph.
    raw = jax.random.bernoulli(k_adj, 0.4, (n_nodes, n_nodes)).astype(jnp.float32)
    upper = jnp.triu(raw, 1)
    adj = jnp.maximum(upper, upper.T)
    same_graph = (seg[:, None] == seg[None, :]).astype(jnp.float32)
    adj = adj * same_graph                                                            # [N, N]

    # Node features h: [N, input_dim]
    h = jax.random.normal(k_h, (n_nodes, INPUT_DIM), jnp.float32)

    params = init_params(k_p)

    out = maskgin_forward(adj, pool_mat, h, params)
    out = jax.block_until_ready(out)

    assert out.shape == (n_graphs, OUTPUT_DIM), out.shape
    assert bool(jnp.all(jnp.isfinite(out)))

    # Numerical check: fused/folded/padded Pallas kernel vs. plain-JAX reference.
    ref = maskgin_reference(adj, pool_mat, h, params)
    assert jnp.allclose(out, ref, atol=1e-4, rtol=1e-4), float(jnp.max(jnp.abs(out - ref)))

    print("KERNEL_OK")
</pallas_src>

<mosaic_0001>
module attributes {stable_mosaic.version = 11 : i64} {
  func.func @_maskgin_fused_kernel(%arg0: memref<16x16xf32, #tpu.memory_space<vmem>>, %arg1: memref<2x16xf32, #tpu.memory_space<vmem>>, %arg2: memref<16x128xf32, #tpu.memory_space<vmem>>, %arg3: memref<128x128xf32, #tpu.memory_space<vmem>>, %arg4: memref<1x128xf32, #tpu.memory_space<vmem>>, %arg5: memref<128x128xf32, #tpu.memory_space<vmem>>, %arg6: memref<1x128xf32, #tpu.memory_space<vmem>>, %arg7: memref<128x128xf32, #tpu.memory_space<vmem>>, %arg8: memref<1x128xf32, #tpu.memory_space<vmem>>, %arg9: memref<128x128xf32, #tpu.memory_space<vmem>>, %arg10: memref<1x128xf32, #tpu.memory_space<vmem>>, %arg11: memref<128x128xf32, #tpu.memory_space<vmem>>, %arg12: memref<1x128xf32, #tpu.memory_space<vmem>>, %arg13: memref<2x128xf32, #tpu.memory_space<vmem>>) attributes {dimension_semantics = [], scalar_prefetch = 0 : i64, scratch_operands = 0 : i64, tpu.core_type = #tpu.core_type<tc>} {
    %c0 = arith.constant 0 : index
    %c0_0 = arith.constant 0 : index
    %0 = vector.load %arg0[%c0, %c0_0] : memref<16x16xf32, #tpu.memory_space<vmem>>, vector<16x16xf32>
    %c0_1 = arith.constant 0 : index
    %c0_2 = arith.constant 0 : index
    %1 = vector.load %arg2[%c0_1, %c0_2] : memref<16x128xf32, #tpu.memory_space<vmem>>, vector<16x128xf32>
    %cst = arith.constant dense<0.000000e+00> : vector<16x128xf32>
    %2 = tpu.matmul %0, %1, %cst {dimension_numbers = #tpu.dot_dimension_numbers<[1], [0], [0], [1], [0, 0, 1, 1], [], []>} : vector<16x16xf32>, vector<16x128xf32>, vector<16x128xf32> -> vector<16x128xf32>
    %3 = arith.addf %1, %2 : vector<16x128xf32>
    %c0_3 = arith.constant 0 : index
    %c0_4 = arith.constant 0 : index
    %4 = vector.load %arg3[%c0_3, %c0_4] : memref<128x128xf32, #tpu.memory_space<vmem>>, vector<128x128xf32>
    %cst_5 = arith.constant dense<0.000000e+00> : vector<16x128xf32>
    %5 = tpu.matmul %3, %4, %cst_5 {dimension_numbers = #tpu.dot_dimension_numbers<[1], [0], [0], [1], [0, 0, 1, 1], [], []>} : vector<16x128xf32>, vector<128x128xf32>, vector<16x128xf32> -> vector<16x128xf32>
    %c0_6 = arith.constant 0 : index
    %c0_7 = arith.constant 0 : index
    %6 = vector.load %arg4[%c0_6, %c0_7] : memref<1x128xf32, #tpu.memory_space<vmem>>, vector<1x128xf32>
    %7 = vector.broadcast %6 : vector<1x128xf32> to vector<16x128xf32>
    %8 = arith.addf %5, %7 : vector<16x128xf32>
    %cst_8 = arith.constant 0.000000e+00 : f32
    %9 = vector.broadcast %cst_8 : f32 to vector<16x128xf32>
    %10 = arith.maximumf %8, %9 : vector<16x128xf32>
    %c0_9 = arith.constant 0 : index
    %c0_10 = arith.constant 0 : index
    %11 = vector.load %arg5[%c0_9, %c0_10] : memref<128x128xf32, #tpu.memory_space<vmem>>, vector<128x128xf32>
    %cst_11 = arith.constant dense<0.000000e+00> : vector<16x128xf32>
    %12 = tpu.matmul %10, %11, %cst_11 {dimension_numbers = #tpu.dot_dimension_numbers<[1], [0], [0], [1], [0, 0, 1, 1], [], []>} : vector<16x128xf32>, vector<128x128xf32>, vector<16x128xf32> -> vector<16x128xf32>
    %c0_12 = arith.constant 0 : index
    %c0_13 = arith.constant 0 : index
    %13 = vector.load %arg6[%c0_12, %c0_13] : memref<1x128xf32, #tpu.memory_space<vmem>>, vector<1x128xf32>
    %14 = vector.broadcast %13 : vector<1x128xf32> to vector<16x128xf32>
    %15 = arith.addf %12, %14 : vector<16x128xf32>
    %cst_14 = arith.constant 0.000000e+00 : f32
    %16 = vector.broadcast %cst_14 : f32 to vector<16x128xf32>
    %17 = arith.maximumf %15, %16 : vector<16x128xf32>
    %cst_15 = arith.constant dense<0.000000e+00> : vector<16x128xf32>
    %18 = tpu.matmul %0, %17, %cst_15 {dimension_numbers = #tpu.dot_dimension_numbers<[1], [0], [0], [1], [0, 0, 1, 1], [], []>} : vector<16x16xf32>, vector<16x128xf32>, vector<16x128xf32> -> vector<16x128xf32>
    %19 = arith.addf %17, %18 : vector<16x128xf32>
    %c0_16 = arith.constant 0 : index
    %c0_17 = arith.constant 0 : index
    %20 = vector.load %arg7[%c0_16, %c0_17] : memref<128x128xf32, #tpu.memory_space<vmem>>, vector<128x128xf32>
    %cst_18 = arith.constant dense<0.000000e+00> : vector<16x128xf32>
    %21 = tpu.matmul %19, %20, %cst_18 {dimension_numbers = #tpu.dot_dimension_numbers<[1], [0], [0], [1], [0, 0, 1, 1], [], []>} : vector<16x128xf32>, vector<128x128xf32>, vector<16x128xf32> -> vector<16x128xf32>
    %c0_19 = arith.constant 0 : index
    %c0_20 = arith.constant 0 : index
    %22 = vector.load %arg8[%c0_19, %c0_20] : memref<1x128xf32, #tpu.memory_space<vmem>>, vector<1x128xf32>
    %23 = vector.broadcast %22 : vector<1x128xf32> to vector<16x128xf32>
    %24 = arith.addf %21, %23 : vector<16x128xf32>
    %cst_21 = arith.constant 0.000000e+00 : f32
    %25 = vector.broadcast %cst_21 : f32 to vector<16x128xf32>
    %26 = arith.maximumf %24, %25 : vector<16x128xf32>
    %c0_22 = arith.constant 0 : index
    %c0_23 = arith.constant 0 : index
    %27 = vector.load %arg9[%c0_22, %c0_23] : memref<128x128xf32, #tpu.memory_space<vmem>>, vector<128x128xf32>
    %cst_24 = arith.constant dense<0.000000e+00> : vector<16x128xf32>
    %28 = tpu.matmul %26, %27, %cst_24 {dimension_numbers = #tpu.dot_dimension_numbers<[1], [0], [0], [1], [0, 0, 1, 1], [], []>} : vector<16x128xf32>, vector<128x128xf32>, vector<16x128xf32> -> vector<16x128xf32>
    %c0_25 = arith.constant 0 : index
    %c0_26 = arith.constant 0 : index
    %29 = vector.load %arg10[%c0_25, %c0_26] : memref<1x128xf32, #tpu.memory_space<vmem>>, vector<1x128xf32>
    %30 = vector.broadcast %29 : vector<1x128xf32> to vector<16x128xf32>
    %31 = arith.addf %28, %30 : vector<16x128xf32>
    %cst_27 = arith.constant 0.000000e+00 : f32
    %32 = vector.broadcast %cst_27 : f32 to vector<16x128xf32>
    %33 = arith.maximumf %31, %32 : vector<16x128xf32>
    %34 = arith.addf %33, %17 : vector<16x128xf32>
    %c0_28 = arith.constant 0 : index
    %c0_29 = arith.constant 0 : index
    %35 = vector.load %arg1[%c0_28, %c0_29] : memref<2x16xf32, #tpu.memory_space<vmem>>, vector<2x16xf32>
    %cst_30 = arith.constant dense<0.000000e+00> : vector<2x128xf32>
    %36 = tpu.matmul %35, %34, %cst_30 {dimension_numbers = #tpu.dot_dimension_numbers<[1], [0], [0], [1], [0, 0, 1, 1], [], []>} : vector<2x16xf32>, vector<16x128xf32>, vector<2x128xf32> -> vector<2x128xf32>
    %c0_31 = arith.constant 0 : index
    %c0_32 = arith.constant 0 : index
    %37 = vector.load %arg11[%c0_31, %c0_32] : memref<128x128xf32, #tpu.memory_space<vmem>>, vector<128x128xf32>
    %cst_33 = arith.constant dense<0.000000e+00> : vector<2x128xf32>
    %38 = tpu.matmul %36, %37, %cst_33 {dimension_numbers = #tpu.dot_dimension_numbers<[1], [0], [0], [1], [0, 0, 1, 1], [], []>} : vector<2x128xf32>, vector<128x128xf32>, vector<2x128xf32> -> vector<2x128xf32>
    %c0_34 = arith.constant 0 : index
    %c0_35 = arith.constant 0 : index
    %39 = vector.load %arg12[%c0_34, %c0_35] : memref<1x128xf32, #tpu.memory_space<vmem>>, vector<1x128xf32>
    %40 = vector.broadcast %39 : vector<1x128xf32> to vector<2x128xf32>
    %41 = arith.addf %38, %40 : vector<2x128xf32>
    %c0_36 = arith.constant 0 : index
    %c0_37 = arith.constant 0 : index
    %42 = vector.load %arg13[%c0_36, %c0_37] : memref<2x128xf32, #tpu.memory_space<vmem>>, vector<2x128xf32>
    tpu.vector_store %arg13[%c0_36, %c0_37], %41 {strides = array<i32>} : memref<2x128xf32, #tpu.memory_space<vmem>>, vector<2x128xf32>,
    return
  }
}

</mosaic_0001>

<bundles_post_ra>
// kernel: tpu_custom_call.1
= control target key start
LH: loop header
LB: loop body
LE: loop exit
PB: predicated region body
PF: predicated region fallthrough
CT: control target
= control target key end

     0   :  { %18 = vsyncpa [#allocation3], 0  ;;  %s921_s0 = inlined_call_operand.hbm [shape: f32[16,16], index: 0, kind: input, shape index: {}]   ;;  %s922_s1 = inlined_call_operand.hbm [shape: f32[2,16], index: 1, kind: input, shape index: {}]   ;;  %s923_s2 = inlined_call_operand.hbm [shape: f32[16,128], index: 2, kind: input, shape index: {}]   ;;  %s924_s3 = inlined_call_operand.hbm [shape: f32[128,128], index: 3, kind: input, shape index: {}]   ;;  %s925_s4 = inlined_call_operand.vmem [shape: f32[1,128], index: 4, kind: input, shape index: {}]   ;;  %s926_s5 = inlined_call_operand.hbm [shape: f32[128,128], index: 5, kind: input, shape index: {}]   ;;  %s927_s6 = inlined_call_operand.vmem [shape: f32[1,128], index: 6, kind: input, shape index: {}]   ;;  %s928_s7 = inlined_call_operand.hbm [shape: f32[128,128], index: 7, kind: input, shape index: {}]   ;;  %s929_s8 = inlined_call_operand.vmem [shape: f32[1,128], index: 8, kind: input, shape index: {}]   ;;  %s930_s9 = inlined_call_operand.hbm [shape: f32[128,128], index: 9, kind: input, shape index: {}]   ;;  %s931_s10 = inlined_call_operand.vmem [shape: f32[1,128], index: 10, kind: input, shape index: {}]   ;;  %s932_s11 = inlined_call_operand.hbm [shape: f32[128,128], index: 11, kind: input, shape index: {}]   ;;  %s933_s12 = inlined_call_operand.vmem [shape: f32[1,128], index: 12, kind: input, shape index: {}]   ;;  %s934_s13 = inlined_call_operand.hbm [shape: f32[2,128], index: 13, kind: output, shape index: {}]  }
   0x1   :  { %19 = vsyncpa [#allocation6], 0 }
   0x2   :  { %20 = vsyncpa [#allocation9], 0 }
   0x3   :  { %21 = vsyncpa [#allocation12], 0 }
   0x4   :  { %22 = vsyncpa [#allocation15], 0  ;;  %s42_s27 = sshll.u32 %s922_s1, 4  ;;  %s43_s27 = int_to_ptr.hbm [resolvable:$true] %s42_s27 }
   0x5   :  { %23 = vsyncpa [#allocation4], 0  ;;  %s746_s28 = smov [#allocation5]   ;;  %s65_s15 = sshll.u32 %s924_s3, 4  ;;  %s66_s15 = int_to_ptr.hbm [resolvable:$true] %s65_s15 }
   0x6   :  { %s44_s29 = sshll.u32 %s746_s28, 4  ;;  %s747_s16 = smov [#allocation8]   ;;  %s45_s29 = int_to_ptr.vmem [resolvable:$true] %s44_s29 }
   0x7   :  { %47 = dma.hbm_to_vmem [thread:$0]  %s43_s27, 32, %s45_s29, [#allocation6]  }
   0x8   :  { %s67_s17 = sshll.u32 %s747_s16, 4  ;;  %s95_s20 = sshll.u32 %s928_s7, 4  ;;  %s68_s17 = int_to_ptr.vmem [resolvable:$true] %s67_s17  ;;  %s96_s20 = int_to_ptr.hbm [resolvable:$true] %s95_s20 }
   0x9   :  { %s748_s1 = smov 128   ;;  %s749_s21 = smov 8  }
   0xa   :  { %73 = dma.hbm_to_vmem [thread:$0]  %s66_s15, 2048, %s68_s17, [#allocation9], %s748_s1, %s748_s1, %s749_s21  }
   0xb   :  { %s28_s24 = sshll.u32 %s921_s0, 4  ;;  %s750_s3 = smov [#allocation11]   ;;  %s29_s24 = int_to_ptr.hbm [resolvable:$true] %s28_s24 }
   0xc   :  { %s97_s25 = sshll.u32 %s750_s3, 4  ;;  %s751_s7 = smov [#allocation2]   ;;  %s98_s25 = int_to_ptr.vmem [resolvable:$true] %s97_s25 }
   0xd   :  { %103 = dma.hbm_to_vmem [thread:$0]  %s96_s20, 2048, %s98_s25, [#allocation12], %s748_s1, %s748_s1, %s749_s21  }
   0xe   :  { %s30_s26 = sshll.u32 %s751_s7, 4  ;;  %s52_s29 = sshll.u32 %s923_s2, 4  ;;  %s31_s26 = int_to_ptr.vmem [resolvable:$true] %s30_s26  ;;  %s53_s29 = int_to_ptr.hbm [resolvable:$true] %s52_s29 }
   0xf   :  { %36 = dma.hbm_to_vmem [thread:$0]  %s29_s24, 256, %s31_s26, [#allocation3], %s748_s1, %s748_s1, %s749_s21  }
  0x10   :  { %s80_s14 = sshll.u32 %s926_s5, 4  ;;  %s752_s15 = smov [#allocation7]   ;;  %s81_s14 = int_to_ptr.hbm [resolvable:$true] %s80_s14 }
  0x11   :  { %s54_s16 = sshll.u32 %s752_s15, 4  ;;  %s753_s17 = smov [#allocation10]   ;;  %s55_s16 = int_to_ptr.vmem [resolvable:$true] %s54_s16 }
  0x12   :  { %60 = dma.hbm_to_vmem [thread:$0]  %s53_s29, 256, %s55_s16, [#allocation6], %s748_s1, %s748_s1, %s749_s21  }
  0x13   :  { %s82_s2 = sshll.u32 %s753_s17, 4  ;;  %s110_s20 = sshll.u32 %s930_s9, 4  ;;  %s83_s2 = int_to_ptr.vmem [resolvable:$true] %s82_s2  ;;  %s111_s20 = int_to_ptr.hbm [resolvable:$true] %s110_s20 }
  0x14   :  { %88 = dma.hbm_to_vmem [thread:$0]  %s81_s14, 2048, %s83_s2, [#allocation9], %s748_s1, %s748_s1, %s749_s21  }
  0x15   :  { %s125_s23 = sshll.u32 %s932_s11, 4  ;;  %s754_s24 = smov [#allocation13]   ;;  %s126_s23 = int_to_ptr.hbm [resolvable:$true] %s125_s23 }
  0x16   :  { %s112_s3 = sshll.u32 %s754_s24, 4  ;;  %s755_s25 = smov [#allocation14]   ;;  %s113_s3 = int_to_ptr.vmem [resolvable:$true] %s112_s3 }
  0x17   :  { %118 = dma.hbm_to_vmem [thread:$0]  %s111_s20, 2048, %s113_s3, [#allocation12], %s748_s1, %s748_s1, %s749_s21  }
  0x18   :  { %s127_s9 = sshll.u32 %s755_s25, 4  ;;  %s128_s9 = int_to_ptr.vmem [resolvable:$true] %s127_s9 }
  0x19   :  { %133 = dma.hbm_to_vmem [thread:$0]  %s126_s23, 2048, %s128_s9, [#allocation15], %s748_s1, %s748_s1, %s749_s21  }
  0x1a   :  { %734 = dma.done.wait [#allocation3], 256  }
  0x1b   :  { %735 = vsyncadd [#allocation3], 4294967040 }
  0x1c   :  { %736 = dma.done.wait [#allocation6], 288  }
  0x1d   :  { %737 = vsyncadd [#allocation6], 4294967008 }
  0x1e   :  { %738 = dma.done.wait [#allocation9], 4096  }
  0x1f   :  { %739 = vsyncadd [#allocation9], 4294963200 }
  0x20   :  { %740 = dma.done.wait [#allocation12], 4096  }
  0x21   :  { %741 = vsyncadd [#allocation12], 4294963200 }
  0x22   :  { %742 = dma.done.wait [#allocation15], 2048  }
  0x23   :  { %743 = vsyncadd [#allocation15], 4294965248  ;;  %v872_v0 = vld [vmem:[#allocation7 + $0x8] sm:$0xff]  ;;  %v874_v1 = vld [vmem:[#allocation7] sm:$0xff]  ;;  %vm172_vm0 = vcmask 130048   ;;  %s756_s28 = smov [#allocation16]  }
  0x24   :  { %193 = vmatpush.msra.mxu0 %v872_v0  ;;  %v877_v2 = vld [vmem:[#allocation2] sm:$0xff]  ;;  %v218_v4 = vld [vmem:[#allocation8 + $0x70] sm:$0xff]  ;;  %v217_v5 = vld [vmem:[#allocation8 + $0x68] sm:$0xff]  ;;  %s481_s29 = sshll.u32 %s756_s28, 4  ;;  %s483_s14 = sshll.u32 %s934_s13, 4  ;;  %s482_s29 = int_to_ptr.vmem [resolvable:$true] %s481_s29  ;;  %s484_s14 = int_to_ptr.hbm [resolvable:$true] %s483_s14 }
  0x25   :  { %v219_v3 = vld [vmem:[#allocation8 + $0x78] sm:$0xff]  ;;  %v216_v6 = vld [vmem:[#allocation8 + $0x60] sm:$0xff]  ;;  %v214_v9 = vld [vmem:[#allocation8 + $0x50] sm:$0xff] }
  0x26   :  { %224 = vmatpush.msra.mxu1 %v219_v3  ;;  %194 = vmatpush.msra.mxu0 %v874_v1  ;;  %v215_v7 = vld [vmem:[#allocation8 + $0x58] sm:$0xff]  ;;  %v882_v8 = vld [vmem:[#allocation2 + $0x8] sm:$0xff]  ;;  %v210_v13 = vld [vmem:[#allocation8 + $0x30] sm:$0xff] }
  0x27   :  { %497 = vmatmul.msk.f32.vlgmr.msra.gmra.mxu0 %vm172_vm0, %v877_v2  ;;  %v213_v10 = vld [vmem:[#allocation8 + $0x48] sm:$0xff]  ;;  %v212_v11 = vld [vmem:[#allocation8 + $0x40] sm:$0xff]  ;;  %v211_v12 = vld [vmem:[#allocation8 + $0x38] sm:$0xff] }
  0x28   :  { %225 = vmatpush.msra.mxu1 %v218_v4  ;;  %v209_v14 = vld [vmem:[#allocation8 + $0x28] sm:$0xff]  ;;  %v208_v15 = vld [vmem:[#allocation8 + $0x20] sm:$0xff]  ;;  %v207_v16 = vld [vmem:[#allocation8 + $0x18] sm:$0xff] }
  0x29   :  { %v206_v17 = vld [vmem:[#allocation8 + $0x10] sm:$0xff]  ;;  %v205_v18 = vld [vmem:[#allocation8 + $0x8] sm:$0xff]  ;;  %v204_v19 = vld [vmem:[#allocation8] sm:$0xff] }
  0x2a   :  { %226 = vmatpush.msra.mxu1 %v217_v5  ;;  %v264_v20 = vld [vmem:[#allocation10 + $0x78] sm:$0xff]  ;;  %v263_v21 = vld [vmem:[#allocation10 + $0x70] sm:$0xff]  ;;  %v262_v22 = vld [vmem:[#allocation10 + $0x68] sm:$0xff] }
  0x2b   :  { %269 = vmatpush.msra.mxu2 %v264_v20  ;;  %v261_v23 = vld [vmem:[#allocation10 + $0x60] sm:$0xff]  ;;  %v260_v24 = vld [vmem:[#allocation10 + $0x58] sm:$0xff]  ;;  %v259_v25 = vld [vmem:[#allocation10 + $0x50] sm:$0xff] }
  0x2c   :  { %227 = vmatpush.msra.mxu1 %v216_v6  ;;  %v258_v26 = vld [vmem:[#allocation10 + $0x48] sm:$0xff]  ;;  %v257_v27 = vld [vmem:[#allocation10 + $0x40] sm:$0xff]  ;;  %v256_v28 = vld [vmem:[#allocation10 + $0x38] sm:$0xff] }
  0x2d   :  { %270 = vmatpush.msra.mxu2 %v263_v21  ;;  %v255_v29 = vld [vmem:[#allocation10 + $0x30] sm:$0xff]  ;;  %v254_v30 = vld [vmem:[#allocation10 + $0x28] sm:$0xff]  ;;  %v253_v31 = vld [vmem:[#allocation10 + $0x20] sm:$0xff] }
  0x2e   :  { %228 = vmatpush.msra.mxu1 %v215_v7  ;;  %v252_v34 = vld [vmem:[#allocation10 + $0x18] sm:$0xff]  ;;  %v251_v37 = vld [vmem:[#allocation10 + $0x10] sm:$0xff]  ;;  %v250_v38 = vld [vmem:[#allocation10 + $0x8] sm:$0xff] }
  0x2f   :  { %498 = vmatmul.msk.f32.gmra.mxu0 %vm172_vm0, %v882_v8  ;;  %271 = vmatpush.msra.mxu2 %v262_v22  ;;  %v249_v39 = vld [vmem:[#allocation10] sm:$0xff]  ;;  %v513_v40 = vld [vmem:[%s925_s4] ss:$0 sm:$0xff]  ;;  %v333_v48 = vld [vmem:[#allocation11 + $0x70] sm:$0xff] }
  0x30   :  { %229 = vmatpush.msra.mxu1 %v214_v9  ;;  %v334_v47 = vld [vmem:[#allocation11 + $0x78] sm:$0xff]  ;;  %v332_v49 = vld [vmem:[#allocation11 + $0x68] sm:$0xff]  ;;  %v331_v50 = vld [vmem:[#allocation11 + $0x60] sm:$0xff] }
  0x31   :  { %272 = vmatpush.msra.mxu2 %v261_v23  ;;  %339 = vmatpush.msrb.mxu0 %v334_v47  ;;  %v330_v51 = vld [vmem:[#allocation11 + $0x58] sm:$0xff]  ;;  %v329_v53 = vld [vmem:[#allocation11 + $0x50] sm:$0xff]  ;;  %v328_v54 = vld [vmem:[#allocation11 + $0x48] sm:$0xff] }
  0x32   :  { %230 = vmatpush.msra.mxu1 %v213_v10  ;;  %v327_v55 = vld [vmem:[#allocation11 + $0x40] sm:$0xff]  ;;  %v514_v56 = vld [vmem:[%s927_s6] ss:$0 sm:$0xff]  ;;  %v325_v59 = vld [vmem:[#allocation11 + $0x30] sm:$0xff] }
  0x33   :  { %273 = vmatpush.msra.mxu2 %v260_v24  ;;  %340 = vmatpush.msrb.mxu0 %v333_v48  ;;  %v326_v57 = vld [vmem:[#allocation11 + $0x38] sm:$0xff]  ;;  %v324_v62 = vld [vmem:[#allocation11 + $0x28] sm:$0xff]  ;;  %v321_v4 = vld [vmem:[#allocation11 + $0x10] sm:$0xff] }
  0x34   :  { %231 = vmatpush.msra.mxu1 %v212_v11  ;;  %v322_v3 = vld [vmem:[#allocation11 + $0x18] sm:$0xff]  ;;  %v320_v5 = vld [vmem:[#allocation11 + $0x8] sm:$0xff]  ;;  %v319_v6 = vld [vmem:[#allocation11] sm:$0xff] }
  0x35   :  { %274 = vmatpush.msra.mxu2 %v259_v25  ;;  %341 = vmatpush.msrb.mxu0 %v332_v49  ;;  %v379_v7 = vld [vmem:[#allocation13 + $0x78] sm:$0xff]  ;;  %v378_v9 = vld [vmem:[#allocation13 + $0x70] sm:$0xff]  ;;  %v377_v10 = vld [vmem:[#allocation13 + $0x68] sm:$0xff] }
  0x36   :  { %232 = vmatpush.msra.mxu1 %v211_v12  ;;  %v376_v11 = vld [vmem:[#allocation13 + $0x60] sm:$0xff]  ;;  %v375_v12 = vld [vmem:[#allocation13 + $0x58] sm:$0xff]  ;;  %v366_v23 = vld [vmem:[#allocation13 + $0x10] sm:$0xff] }
  0x37   :  { %275 = vmatpush.msra.mxu2 %v258_v26  ;;  %342 = vmatpush.msrb.mxu0 %v331_v50  ;;  %v367_v20 = vld [vmem:[#allocation13 + $0x18] sm:$0xff]  ;;  %v365_v24 = vld [vmem:[#allocation13 + $0x8] sm:$0xff]  ;;  %v364_v25 = vld [vmem:[#allocation13] sm:$0xff] }
  0x38   :  { %233 = vmatpush.msra.mxu1 %v210_v13  ;;  %v373_v13 = vld [vmem:[#allocation13 + $0x48] sm:$0xff]  ;;  %v515_v26 = vld [vmem:[%s929_s8] ss:$0 sm:$0xff] }
  0x39   :  { %276 = vmatpush.msra.mxu2 %v257_v27  ;;  %343 = vmatpush.msrb.mxu0 %v330_v51  ;;  %v438_v49 = vld [vmem:[#allocation14 + $0x18] sm:$0xff]  ;;  %v437_v51 = vld [vmem:[#allocation14 + $0x10] sm:$0xff] }
  0x3a   :  { %234 = vmatpush.msra.mxu1 %v209_v14  ;;  %v372_v14 = vld [vmem:[#allocation13 + $0x40] sm:$0xff] }
  0x3b   :  { %277 = vmatpush.msra.mxu2 %v256_v28  ;;  %344 = vmatpush.msrb.mxu0 %v329_v53 }
  0x3c   :  { %235 = vmatpush.msra.mxu1 %v208_v15  ;;  %v370_v15 = vld [vmem:[#allocation13 + $0x30] sm:$0xff] }
  0x3d   :  { %278 = vmatpush.msra.mxu2 %v255_v29  ;;  %345 = vmatpush.msrb.mxu0 %v328_v54  ;;  %v436_v54 = vld [vmem:[#allocation14 + $0x8] sm:$0xff] }
  0x3e   :  { %236 = vmatpush.msra.mxu1 %v207_v16  ;;  %v369_v16 = vld [vmem:[#allocation13 + $0x28] sm:$0xff] }
  0x3f   :  { %279 = vmatpush.msra.mxu2 %v254_v30  ;;  %346 = vmatpush.msrb.mxu0 %v327_v55 }
  0x40   :  { %237 = vmatpush.msra.mxu1 %v206_v17  ;;  %v368_v17 = vld [vmem:[#allocation13 + $0x20] sm:$0xff] }
  0x41   :  { %280 = vmatpush.msra.mxu2 %v253_v31  ;;  %347 = vmatpush.msrb.mxu0 %v326_v57  ;;  %v411_v57 = vld [vmem:[#allocation5] sm:$0x3] }
  0x42   :  { %238 = vmatpush.msra.mxu1 %v205_v18 }
  0x43   :  { %281 = vmatpush.msra.mxu2 %v252_v34  ;;  %348 = vmatpush.msrb.mxu0 %v325_v59  ;;  %v449_v34 = vld [vmem:[#allocation14 + $0x70] sm:$0xff] }
  0x44   :  { %239 = vmatpush.msra.mxu1 %v204_v19 }
  0x45   :  { %282 = vmatpush.msra.mxu2 %v251_v37  ;;  %349 = vmatpush.msrb.mxu0 %v324_v62  ;;  %v446_v37 = vld [vmem:[#allocation14 + $0x58] sm:$0xff] }
  0x47   :  { %283 = vmatpush.msra.mxu2 %v250_v38  ;;  %v445_v38 = vld [vmem:[#allocation14 + $0x50] sm:$0xff] }
  0x49   :  { %284 = vmatpush.msra.mxu2 %v249_v39  ;;  %v444_v39 = vld [vmem:[#allocation14 + $0x48] sm:$0xff] }
  0xa4   :  { %v196_v32 = vpop.f32.mrf.mxu0 }
  0xa5   :  { %v202_v33 = vadd.f32 %v196_v32, %v874_v1 }
  0xa7   :  { %240 = vmatmul.f32.vlgmr.msra.gmra.mxu1 %v202_v33  ;;  %v450_v33 = vld [vmem:[#allocation14 + $0x78] sm:$0xff] }
  0xa8   :  { %455 = vmatpush.msrb.mxu2 %v450_v33 }
  0xaa   :  { %456 = vmatpush.msrb.mxu2 %v449_v34 }
  0xac   :  { %v199_v35 = vpop.f32.mrf.mxu0 }
  0xad   :  { %v203_v36 = vadd.f32 %v199_v35, %v872_v0  ;;  %v323_v0 = vld [vmem:[#allocation11 + $0x20] sm:$0xff]  ;;  %v448_v35 = vld [vmem:[#allocation14 + $0x68] sm:$0xff] }
  0xae   :  { %350 = vmatpush.msrb.mxu0 %v323_v0  ;;  %457 = vmatpush.msrb.mxu2 %v448_v35 }
  0xaf   :  { %243 = vmatmul.f32.gmra.mxu1 %v203_v36  ;;  %v447_v36 = vld [vmem:[#allocation14 + $0x60] sm:$0xff] }
  0xb0   :  { %351 = vmatpush.msrb.mxu0 %v322_v3  ;;  %458 = vmatpush.msrb.mxu2 %v447_v36 }
  0xb2   :  { %352 = vmatpush.msrb.mxu0 %v321_v4  ;;  %459 = vmatpush.msrb.mxu2 %v446_v37 }
  0xb4   :  { %353 = vmatpush.msrb.mxu0 %v320_v5  ;;  %460 = vmatpush.msrb.mxu2 %v445_v38 }
  0xb6   :  { %354 = vmatpush.msrb.mxu0 %v319_v6  ;;  %461 = vmatpush.msrb.mxu2 %v444_v39 }
 0x124   :  { %v241_v41 = vpop.f32.mrf.mxu1 }
 0x125   :  { %v242_v42 = vadd.f32 %v513_v40, %v241_v41 }
 0x127   :  { %v247_v43 = vmax.f32 %v242_v42, 0.0  ;;  %v442_v42 = vld [vmem:[#allocation14 + $0x38] sm:$0xff] }
 0x129   :  { %285 = vmatmul.f32.vlgmr.msra.gmra.mxu2 %v247_v43  ;;  %v441_v43 = vld [vmem:[#allocation14 + $0x30] sm:$0xff] }
 0x12c   :  { %v244_v44 = vpop.f32.mrf.mxu1 }
 0x12d   :  { %v245_v45 = vadd.f32 %v513_v40, %v244_v44  ;;  %v443_v40 = vld [vmem:[#allocation14 + $0x40] sm:$0xff]  ;;  %v516_v44 = vld [vmem:[%s931_s10] ss:$0 sm:$0xff] }
 0x12e   :  { %462 = vmatpush.msrb.mxu2 %v443_v40 }
 0x12f   :  { %v248_v46 = vmax.f32 %v245_v45, 0.0  ;;  %v440_v45 = vld [vmem:[#allocation14 + $0x28] sm:$0xff] }
 0x130   :  { %463 = vmatpush.msrb.mxu2 %v442_v42 }
 0x131   :  { %288 = vmatmul.f32.gmra.mxu2 %v248_v46  ;;  %v439_v46 = vld [vmem:[#allocation14 + $0x20] sm:$0xff] }
 0x132   :  { %464 = vmatpush.msrb.mxu2 %v441_v43 }
 0x134   :  { %465 = vmatpush.msrb.mxu2 %v440_v45 }
 0x136   :  { %466 = vmatpush.msrb.mxu2 %v439_v46 }
 0x138   :  { %467 = vmatpush.msrb.mxu2 %v438_v49 }
 0x13a   :  { %468 = vmatpush.msrb.mxu2 %v437_v51 }
 0x13c   :  { %469 = vmatpush.msrb.mxu2 %v436_v54 }
 0x1ac   :  { %v286_v52 = vpop.f32.mrf.mxu2 }
 0x1ad   :  { %v287_v60 = vadd.f32 %v514_v56, %v286_v52 }
 0x1af   :  { %v896_v1 = vmax.f32 %v287_v60, 0.0  ;;  %v517_v60 = vld [vmem:[%s933_s12] ss:$0 sm:$0xff] }
 0x1b4   :  { %v289_v58 = vpop.f32.mrf.mxu2 }
 0x1b5   :  { %v290_v61 = vadd.f32 %v514_v56, %v289_v58  ;;  %v435_v58 = vld [vmem:[#allocation14] sm:$0xff] }
 0x1b6   :  { %470 = vmatpush.msrb.mxu2 %v435_v58 }
 0x1b7   :  { %v894_v63 = vmax.f32 %v290_v61, 0.0 }
 0x1b9   :  { %308 = vmatpush.msra.mxu3 %v894_v63 }
 0x1bb   :  { %309 = vmatpush.msra.mxu3 %v896_v1 }
 0x1bc   :  { %499 = vmatmul.msk.f32.vlgmr.msra.gmra.mxu3 %vm172_vm0, %v877_v2  ;;  %v374_v2 = vld [vmem:[#allocation13 + $0x50] sm:$0xff] }
 0x1bd   :  { %384 = vmatpush.msrb.mxu3 %v379_v7 }
 0x1bf   :  { %385 = vmatpush.msrb.mxu3 %v378_v9 }
 0x1c1   :  { %386 = vmatpush.msrb.mxu3 %v377_v10 }
 0x1c3   :  { %387 = vmatpush.msrb.mxu3 %v376_v11 }
 0x1c4   :  { %500 = vmatmul.msk.f32.gmra.mxu3 %vm172_vm0, %v882_v8  ;;  %v371_v8 = vld [vmem:[#allocation13 + $0x38] sm:$0xff] }
 0x1c5   :  { %388 = vmatpush.msrb.mxu3 %v375_v12 }
 0x1c7   :  { %389 = vmatpush.msrb.mxu3 %v374_v2 }
 0x1c9   :  { %390 = vmatpush.msrb.mxu3 %v373_v13 }
 0x1cb   :  { %391 = vmatpush.msrb.mxu3 %v372_v14 }
 0x1cd   :  { %392 = vmatpush.msrb.mxu3 %v371_v8 }
 0x1cf   :  { %393 = vmatpush.msrb.mxu3 %v370_v15 }
 0x1d1   :  { %394 = vmatpush.msrb.mxu3 %v369_v16 }
 0x1d3   :  { %395 = vmatpush.msrb.mxu3 %v368_v17 }
 0x1d5   :  { %396 = vmatpush.msrb.mxu3 %v367_v20 }
 0x1d7   :  { %397 = vmatpush.msrb.mxu3 %v366_v23 }
 0x1d9   :  { %398 = vmatpush.msrb.mxu3 %v365_v24 }
 0x1db   :  { %399 = vmatpush.msrb.mxu3 %v364_v25 }
 0x23f   :  { %v311_v18 = vpop.f32.mrf.mxu3 }
 0x240   :  { %v317_v19 = vadd.f32 %v311_v18, %v896_v1 }
 0x242   :  { %355 = vmatmul.f32.vlgmr.msrb.gmra.mxu0 %v317_v19 }
 0x247   :  { %v314_v21 = vpop.f32.mrf.mxu3 }
 0x248   :  { %v318_v22 = vadd.f32 %v314_v21, %v894_v63 }
 0x24a   :  { %358 = vmatmul.f32.gmra.mxu0 %v318_v22 }
 0x2bf   :  { %v356_v27 = vpop.f32.mrf.mxu0 }
 0x2c0   :  { %v357_v28 = vadd.f32 %v515_v26, %v356_v27 }
 0x2c2   :  { %v362_v29 = vmax.f32 %v357_v28, 0.0 }
 0x2c4   :  { %400 = vmatmul.f32.vlgmr.msrb.gmra.mxu3 %v362_v29 }
 0x2c7   :  { %v359_v30 = vpop.f32.mrf.mxu0 }
 0x2c8   :  { %v360_v31 = vadd.f32 %v515_v26, %v359_v30 }
 0x2ca   :  { %v363_v32 = vmax.f32 %v360_v31, 0.0 }
 0x2cc   :  { %403 = vmatmul.f32.gmra.mxu3 %v363_v32 }
 0x347   :  { %v401_v41 = vpop.f32.mrf.mxu3 }
 0x348   :  { %v402_v47 = vadd.f32 %v516_v44, %v401_v41 }
 0x34a   :  { %v407_v52 = vmax.f32 %v402_v47, 0.0 }
 0x34c   :  { %v409_v56 = vadd.f32 %v407_v52, %v896_v1 }
 0x34f   :  { %v404_v48 = vpop.f32.mrf.mxu3 }
 0x350   :  { %v405_v50 = vadd.f32 %v516_v44, %v404_v48 }
 0x352   :  { %v408_v53 = vmax.f32 %v405_v50, 0.0 }
 0x354   :  { %v410_v55 = vadd.f32 %v408_v53, %v894_v63 }
 0x356   :  { %429 = vmatpush.msrb.mxu1 %v410_v55 }
 0x358   :  { %430 = vmatpush.msrb.mxu1 %v409_v56 }
 0x359   :  { %501 = vmatmul.msk.f32.vlgmr.msrb.gmra.mxu1 %vm172_vm0, %v411_v57 }
 0x3d6   :  { %v432_v59 = vpop.f32.mrf.mxu1 }
 0x3d7   :  { %471 = vmatmul.f32.vlgmr.msrb.gmra.mxu2 %v432_v59 }
 0x45a   :  { %v472_v61 = vpop.f32.mrf.mxu2 }
 0x45b   :  { %v473_v62 = vadd.f32 %v517_v60, %v472_v61 }
 0x45d   :  { %475 = vst [vmem:[#allocation16] sm:$0x3] %v473_v62 }
 0x45e   :  { %486 = dma.vmem_to_hbm [thread:$0]  %s482_s29, 32, %s484_s14, [#allocation4]  }
 0x45f   :  { %744 = dma.done.wait [#allocation4], 32  }
 0x460   :  { %745 = vsyncadd [#allocation4], 4294967264 }
 0x461   :  { %491 = vsyncpa [#allocation3], 1 }
 0x462   :  { %492 = vsyncpa [#allocation6], 1 }
 0x463   :  { %493 = vsyncpa [#allocation9], 1 }
 0x464   :  { %494 = vsyncpa [#allocation12], 1 }
 0x465   :  { %495 = vsyncpa [#allocation15], 1 }
 0x466   :  { %496 = vsyncpa [#allocation4], 1 }

</bundles_post_ra>
